<compile_context>
chip_gen: v7x
topology: tpu7x:2x2x1
jax: 0.10.0
libtpu: 0.0.40
codegen_flags: <defaults>
</compile_context>

<pallas_src>
import jax
import jax.numpy as jnp
from jax.experimental import pallas as pl
from jax.experimental.pallas import tpu as pltpu


def _rup8(n):
    return ((n + 7) // 8) * 8


def _make_kernel(N, T, V, F):
    NT = N * T
    VV = V * V
    inv_NT = 1.0 / NT
    inv_N = 1.0 / N
    log2V = V.bit_length() - 1

    S_ROWS = _rup8(NT)      # slab rows 0..              : S (outputs), lane = i*V + j
    SM_ROWS = _rup8(T)      # next block                 : S mean over batch (first T rows)
    D_ROWS = _rup8(F)       # last block                 : diff mean over (n,t) (first F rows)

    def lane_group_reduce(x, op):
        """Reduce lanes {j, j+V, ..., j+(V-1)*V} (i.e. over i for fixed j) with `op`,
        result broadcast back to all VV lanes.  Vreg-aligned halving folds down to a
        single 128-lane vreg, then an XLU lane-roll butterfly, then a lane concat to
        re-broadcast.  Requires V (hence VV) to be a power of two."""
        w = VV
        r = x
        while w > 128:                       # fold multi-vreg width down to one vreg
            w //= 2
            r = op(r[:, :w], r[:, w:])
        s = w // 2
        while s >= V:                        # butterfly within a single vreg
            r = op(r, pltpu.roll(r, shift=s, axis=1))
            s //= 2
        if VV > w:                           # broadcast back to full VV lanes
            r = jnp.concatenate([r] * (VV // w), axis=1)
        return r

    def kernel(a_ref, x_ref, out_ref):
        # ---- constant +/-1 pairwise-expansion matrix, built in-kernel (no HBM) ----
        # E[v, i*V + j] = (v == i) - (v == j); entries are exactly representable in bf16.
        lane = jax.lax.broadcasted_iota(jnp.int32, (V, VV), 1)
        row = jax.lax.broadcasted_iota(jnp.int32, (V, VV), 0)
        e_diff = ((row == (lane >> log2V)).astype(jnp.float32)
                  - (row == (lane & (V - 1))).astype(jnp.float32)
                  ).astype(jnp.bfloat16)

        # ---- pairwise differences on the MXU, f32-exact via bf16x3 splitting ----
        x32 = x_ref[...]                                       # (F*NT, V) float32
        x0 = x32.astype(jnp.bfloat16)
        r1 = x32 - x0.astype(jnp.float32)
        x1 = r1.astype(jnp.bfloat16)
        x2 = (r1 - x1.astype(jnp.float32)).astype(jnp.bfloat16)
        d_signed = (jnp.dot(x0, e_diff, preferred_element_type=jnp.float32)
                    + jnp.dot(x1, e_diff, preferred_element_type=jnp.float32)
                    + jnp.dot(x2, e_diff, preferred_element_type=jnp.float32))
        d_all = jnp.abs(d_signed)                              # (F*NT, VV) = |x_i - x_j|

        # ---- per-feature loop: diff_mean slab + weighted feature sum (VPU/XLU) ----
        sub = jax.lax.broadcasted_iota(jnp.int32, (D_ROWS, VV), 0)
        diff_slab = jnp.zeros((D_ROWS, VV), jnp.float32)
        diff_re = None
        for f in range(F):                                     # static unroll, F == 5
            d_f = d_all[f * NT:(f + 1) * NT, :]                # sublane-aligned slice
            row_f = jnp.sum(d_f, axis=0, keepdims=True) * inv_NT      # mean over (n,t)
            diff_slab = jnp.where(sub == f,
                                  jnp.broadcast_to(row_f, (D_ROWS, VV)), diff_slab)
            term = d_f * a_ref[f]                              # scalar weight from SMEM
            diff_re = term if diff_re is None else diff_re + term

        # ---- per-column (over i) max / min / sum, normalized similarity ----
        M = lane_group_reduce(diff_re, jnp.maximum)
        m = lane_group_reduce(diff_re, jnp.minimum)
        # NOTE: matches torch semantics; inf/NaN if a whole column is constant (M == m).
        tmpS = jnp.exp((diff_re - M) * pl.reciprocal(M - m, approx=False))
        ssum = lane_group_reduce(tmpS, jnp.add)
        S = tmpS * pl.reciprocal(ssum, approx=False)           # (NT, VV)

        # ---- mean over batch n (rows n*T + t) via sublane roll-fold (XLU slot) ----
        acc = S
        shift = NT // 2
        while shift >= T:                                      # N is a power of two
            acc = acc + pltpu.roll(acc, shift=shift, axis=0)
            shift //= 2
        smean = acc * inv_N                                    # rows 0:T hold the mean

        # ---- pack everything into one lane-dense slab -> single unmasked store ----
        s_blk = S
        if S_ROWS > NT:
            s_blk = jnp.concatenate(
                [s_blk, jnp.zeros((S_ROWS - NT, VV), jnp.float32)], axis=0)
        if NT >= SM_ROWS:
            sm_blk = smean[:SM_ROWS, :]
        else:
            sm_blk = jnp.concatenate(
                [smean, jnp.zeros((SM_ROWS - NT, VV), jnp.float32)], axis=0)
        out_ref[...] = jnp.concatenate([s_blk, sm_blk, diff_slab], axis=0)

    return kernel


def fcgraph_forward(x, a):
    """x: (N, T, V, F), a: (F, 1) (the torch (5, 1) parameter).

    Returns (outputs (N,T,V,V), S_mean (T,V,V), diff_mean (V,V,F)) in float32,
    matching the PyTorch FCGraph.forward semantics."""
    N, T, V, F = x.shape
    NT, VV = N * T, V * V
    assert V <= 128 and (V & (V - 1)) == 0, "V must be a power of two <= 128"
    assert (N & (N - 1)) == 0, "N must be a power of two (batch-mean roll fold)"

    x = x.astype(jnp.float32)
    a_vec = a.reshape(-1).astype(jnp.float32)                  # (F,) -> SMEM scalars

    # Layout plumbing only (~2.5 KB): (N,T,V,F) -> (F*N*T, V).  No pairwise expansion
    # is materialized in HBM; the kernel builds it on the MXU.
    xall = jnp.transpose(x, (3, 0, 1, 2)).reshape(F * NT, V)

    S_ROWS, SM_ROWS, D_ROWS = _rup8(NT), _rup8(T), _rup8(F)
    total_rows = S_ROWS + SM_ROWS + D_ROWS                     # 24 for (2,4,16,5)

    slab = pl.pallas_call(
        _make_kernel(N, T, V, F),
        out_shape=jax.ShapeDtypeStruct((total_rows, VV), jnp.float32),
        in_specs=[
            pl.BlockSpec(memory_space=pltpu.MemorySpace.SMEM),   # a: F scalar weights
            pl.BlockSpec(memory_space=pltpu.MemorySpace.VMEM),   # features (F*NT, V)
        ],
        out_specs=pl.BlockSpec(memory_space=pltpu.MemorySpace.VMEM),
    )(a_vec, xall)

    outputs = slab[0:NT].reshape(N, T, V, V)                   # nt = n*T + t, lane = i*V+j
    S_mean = slab[S_ROWS:S_ROWS + T].reshape(T, V, V)
    diff_mean = jnp.transpose(
        slab[S_ROWS + SM_ROWS:S_ROWS + SM_ROWS + F].reshape(F, V, V), (1, 2, 0))
    return outputs, S_mean, diff_mean


def fcgraph_ref(x, a):
    """Pure-JAX reference mirroring the PyTorch forward."""
    N, T, V, F = x.shape
    x = x.astype(jnp.float32)
    a_vec = a.reshape(-1).astype(jnp.float32)                           # (F,)
    ad = jnp.abs(x[:, :, :, None, :] - x[:, :, None, :, :])             # (N,T,V,V,F)
    diff_re = jnp.sum(ad * a_vec, axis=-1)                              # (N,T,V,V)
    M = jnp.max(diff_re, axis=2, keepdims=True)
    m = jnp.min(diff_re, axis=2, keepdims=True)
    tmpS = jnp.exp((diff_re - M) / (M - m))
    S = tmpS / jnp.sum(tmpS, axis=2, keepdims=True)                     # (N,T,V,V)
    S_mean = jnp.mean(S, axis=0)                                        # (T,V,V)
    diff_mean = jnp.mean(jnp.sum(ad, axis=1), axis=0) / T               # (V,V,F)
    return S, S_mean, diff_mean


if __name__ == "__main__":
    # Shapes: batch N=2, timesteps T=4, vertices V=16, features F=5
    # (F must be 5 to match the (5, 1) parameter `a` of the module).
    N, T, V, F = 2, 4, 16, 5
    key = jax.random.PRNGKey(0)
    kx, ka = jax.random.split(key)
    x = jax.random.normal(kx, (N, T, V, F), dtype=jnp.float32)
    # nn.init.uniform_(self.a): uniform in [0, 1), torch shape (5, 1)
    a = jax.random.uniform(ka, (F, 1), dtype=jnp.float32)

    fwd = jax.jit(fcgraph_forward)
    outputs, S_mean, diff_mean = jax.block_until_ready(fwd(x, a))

    r_out, r_S, r_diff = fcgraph_ref(x, a)
    assert outputs.shape == (N, T, V, V)
    assert S_mean.shape == (T, V, V)
    assert diff_mean.shape == (V, V, F)
    assert jnp.allclose(outputs, r_out, atol=1e-5, rtol=1e-5)
    assert jnp.allclose(S_mean, r_S, atol=1e-5, rtol=1e-5)
    assert jnp.allclose(diff_mean, r_diff, atol=1e-5, rtol=1e-5)

    print("KERNEL_OK")
</pallas_src>

<mosaic_0001>
module attributes {stable_mosaic.version = 11 : i64} {
  func.func @kernel(%arg0: memref<5xf32, #tpu.memory_space<smem>>, %arg1: memref<40x16xf32, #tpu.memory_space<vmem>>, %arg2: memref<24x256xf32, #tpu.memory_space<vmem>>) attributes {dimension_semantics = [], scalar_prefetch = 0 : i64, scratch_operands = 0 : i64, tpu.core_type = #tpu.core_type<tc>} {
    %0 = tpu.iota {dimensions = array<i32: 1>} : vector<16x256xi32>
    %1 = tpu.iota {dimensions = array<i32: 0>} : vector<16x256xi32>
    %c4_i32 = arith.constant 4 : i32
    %2 = vector.broadcast %c4_i32 : i32 to vector<16x256xi32>
    %3 = arith.shrsi %0, %2 : vector<16x256xi32>
    %4 = arith.cmpi eq, %1, %3 : vector<16x256xi32>
    %5 = arith.extui %4 : vector<16x256xi1> to vector<16x256xi32>
    %6 = arith.sitofp %5 : vector<16x256xi32> to vector<16x256xf32>
    %c15_i32 = arith.constant 15 : i32
    %7 = vector.broadcast %c15_i32 : i32 to vector<16x256xi32>
    %8 = arith.andi %0, %7 : vector<16x256xi32>
    %9 = arith.cmpi eq, %1, %8 : vector<16x256xi32>
    %10 = arith.extui %9 : vector<16x256xi1> to vector<16x256xi32>
    %11 = arith.sitofp %10 : vector<16x256xi32> to vector<16x256xf32>
    %12 = arith.subf %6, %11 : vector<16x256xf32>
    %13 = arith.truncf %12 : vector<16x256xf32> to vector<16x256xbf16>
    %c0 = arith.constant 0 : index
    %c0_0 = arith.constant 0 : index
    %14 = vector.load %arg1[%c0, %c0_0] : memref<40x16xf32, #tpu.memory_space<vmem>>, vector<40x16xf32>
    %15 = arith.truncf %14 : vector<40x16xf32> to vector<40x16xbf16>
    %16 = arith.extf %15 : vector<40x16xbf16> to vector<40x16xf32>
    %17 = arith.subf %14, %16 : vector<40x16xf32>
    %18 = arith.truncf %17 : vector<40x16xf32> to vector<40x16xbf16>
    %19 = arith.extf %18 : vector<40x16xbf16> to vector<40x16xf32>
    %20 = arith.subf %17, %19 : vector<40x16xf32>
    %21 = arith.truncf %20 : vector<40x16xf32> to vector<40x16xbf16>
    %cst = arith.constant dense<0.000000e+00> : vector<40x256xf32>
    %22 = tpu.matmul %15, %13, %cst {dimension_numbers = #tpu.dot_dimension_numbers<[1], [0], [0], [1], [0, 0, 1, 1], [], []>} : vector<40x16xbf16>, vector<16x256xbf16>, vector<40x256xf32> -> vector<40x256xf32>
    %cst_1 = arith.constant dense<0.000000e+00> : vector<40x256xf32>
    %23 = tpu.matmul %18, %13, %cst_1 {dimension_numbers = #tpu.dot_dimension_numbers<[1], [0], [0], [1], [0, 0, 1, 1], [], []>} : vector<40x16xbf16>, vector<16x256xbf16>, vector<40x256xf32> -> vector<40x256xf32>
    %24 = arith.addf %22, %23 : vector<40x256xf32>
    %cst_2 = arith.constant dense<0.000000e+00> : vector<40x256xf32>
    %25 = tpu.matmul %21, %13, %cst_2 {dimension_numbers = #tpu.dot_dimension_numbers<[1], [0], [0], [1], [0, 0, 1, 1], [], []>} : vector<40x16xbf16>, vector<16x256xbf16>, vector<40x256xf32> -> vector<40x256xf32>
    %26 = arith.addf %24, %25 : vector<40x256xf32>
    %27 = math.absf %26 : vector<40x256xf32>
    %28 = tpu.iota {dimensions = array<i32: 0>} : vector<8x256xi32>
    %cst_3 = arith.constant 0.000000e+00 : f32
    %29 = vector.broadcast %cst_3 : f32 to vector<8x256xf32>
    %30 = vector.extract_strided_slice %27 {offsets = [0, 0], sizes = [8, 256], strides = [1, 1]} : vector<40x256xf32> to vector<8x256xf32>
    %cst_4 = arith.constant dense<0.000000e+00> : vector<256xf32>
    %31 = vector.multi_reduction <add>, %30, %cst_4 [0] : vector<8x256xf32> to vector<256xf32>
    %32 = vector.shape_cast %31 : vector<256xf32> to vector<1x256xf32>
    %cst_5 = arith.constant 1.250000e-01 : f32
    %33 = vector.broadcast %cst_5 : f32 to vector<1x256xf32>
    %34 = arith.mulf %32, %33 : vector<1x256xf32>
    %c0_i32 = arith.constant 0 : i32
    %35 = vector.broadcast %c0_i32 : i32 to vector<8x256xi32>
    %36 = arith.cmpi eq, %28, %35 : vector<8x256xi32>
    %37 = vector.shape_cast %34 : vector<1x256xf32> to vector<1x256xf32>
    %38 = vector.broadcast %37 : vector<1x256xf32> to vector<8x256xf32>
    %39 = arith.select %36, %38, %29 : vector<8x256xi1>, vector<8x256xf32>
    %c0_6 = arith.constant 0 : index
    %40 = memref.load %arg0[%c0_6] : memref<5xf32, #tpu.memory_space<smem>>
    %41 = vector.broadcast %40 : f32 to vector<8x256xf32>
    %42 = arith.mulf %30, %41 : vector<8x256xf32>
    %43 = vector.extract_strided_slice %27 {offsets = [8, 0], sizes = [8, 256], strides = [1, 1]} : vector<40x256xf32> to vector<8x256xf32>
    %cst_7 = arith.constant dense<0.000000e+00> : vector<256xf32>
    %44 = vector.multi_reduction <add>, %43, %cst_7 [0] : vector<8x256xf32> to vector<256xf32>
    %45 = vector.shape_cast %44 : vector<256xf32> to vector<1x256xf32>
    %cst_8 = arith.constant 1.250000e-01 : f32
    %46 = vector.broadcast %cst_8 : f32 to vector<1x256xf32>
    %47 = arith.mulf %45, %46 : vector<1x256xf32>
    %c1_i32 = arith.constant 1 : i32
    %48 = vector.broadcast %c1_i32 : i32 to vector<8x256xi32>
    %49 = arith.cmpi eq, %28, %48 : vector<8x256xi32>
    %50 = vector.shape_cast %47 : vector<1x256xf32> to vector<1x256xf32>
    %51 = vector.broadcast %50 : vector<1x256xf32> to vector<8x256xf32>
    %52 = arith.select %49, %51, %39 : vector<8x256xi1>, vector<8x256xf32>
    %c1 = arith.constant 1 : index
    %53 = memref.load %arg0[%c1] : memref<5xf32, #tpu.memory_space<smem>>
    %54 = vector.broadcast %53 : f32 to vector<8x256xf32>
    %55 = arith.mulf %43, %54 : vector<8x256xf32>
    %56 = arith.addf %42, %55 : vector<8x256xf32>
    %57 = vector.extract_strided_slice %27 {offsets = [16, 0], sizes = [8, 256], strides = [1, 1]} : vector<40x256xf32> to vector<8x256xf32>
    %cst_9 = arith.constant dense<0.000000e+00> : vector<256xf32>
    %58 = vector.multi_reduction <add>, %57, %cst_9 [0] : vector<8x256xf32> to vector<256xf32>
    %59 = vector.shape_cast %58 : vector<256xf32> to vector<1x256xf32>
    %cst_10 = arith.constant 1.250000e-01 : f32
    %60 = vector.broadcast %cst_10 : f32 to vector<1x256xf32>
    %61 = arith.mulf %59, %60 : vector<1x256xf32>
    %c2_i32 = arith.constant 2 : i32
    %62 = vector.broadcast %c2_i32 : i32 to vector<8x256xi32>
    %63 = arith.cmpi eq, %28, %62 : vector<8x256xi32>
    %64 = vector.shape_cast %61 : vector<1x256xf32> to vector<1x256xf32>
    %65 = vector.broadcast %64 : vector<1x256xf32> to vector<8x256xf32>
    %66 = arith.select %63, %65, %52 : vector<8x256xi1>, vector<8x256xf32>
    %c2 = arith.constant 2 : index
    %67 = memref.load %arg0[%c2] : memref<5xf32, #tpu.memory_space<smem>>
    %68 = vector.broadcast %67 : f32 to vector<8x256xf32>
    %69 = arith.mulf %57, %68 : vector<8x256xf32>
    %70 = arith.addf %56, %69 : vector<8x256xf32>
    %71 = vector.extract_strided_slice %27 {offsets = [24, 0], sizes = [8, 256], strides = [1, 1]} : vector<40x256xf32> to vector<8x256xf32>
    %cst_11 = arith.constant dense<0.000000e+00> : vector<256xf32>
    %72 = vector.multi_reduction <add>, %71, %cst_11 [0] : vector<8x256xf32> to vector<256xf32>
    %73 = vector.shape_cast %72 : vector<256xf32> to vector<1x256xf32>
    %cst_12 = arith.constant 1.250000e-01 : f32
    %74 = vector.broadcast %cst_12 : f32 to vector<1x256xf32>
    %75 = arith.mulf %73, %74 : vector<1x256xf32>
    %c3_i32 = arith.constant 3 : i32
    %76 = vector.broadcast %c3_i32 : i32 to vector<8x256xi32>
    %77 = arith.cmpi eq, %28, %76 : vector<8x256xi32>
    %78 = vector.shape_cast %75 : vector<1x256xf32> to vector<1x256xf32>
    %79 = vector.broadcast %78 : vector<1x256xf32> to vector<8x256xf32>
    %80 = arith.select %77, %79, %66 : vector<8x256xi1>, vector<8x256xf32>
    %c3 = arith.constant 3 : index
    %81 = memref.load %arg0[%c3] : memref<5xf32, #tpu.memory_space<smem>>
    %82 = vector.broadcast %81 : f32 to vector<8x256xf32>
    %83 = arith.mulf %71, %82 : vector<8x256xf32>
    %84 = arith.addf %70, %83 : vector<8x256xf32>
    %85 = vector.extract_strided_slice %27 {offsets = [32, 0], sizes = [8, 256], strides = [1, 1]} : vector<40x256xf32> to vector<8x256xf32>
    %cst_13 = arith.constant dense<0.000000e+00> : vector<256xf32>
    %86 = vector.multi_reduction <add>, %85, %cst_13 [0] : vector<8x256xf32> to vector<256xf32>
    %87 = vector.shape_cast %86 : vector<256xf32> to vector<1x256xf32>
    %cst_14 = arith.constant 1.250000e-01 : f32
    %88 = vector.broadcast %cst_14 : f32 to vector<1x256xf32>
    %89 = arith.mulf %87, %88 : vector<1x256xf32>
    %c4_i32_15 = arith.constant 4 : i32
    %90 = vector.broadcast %c4_i32_15 : i32 to vector<8x256xi32>
    %91 = arith.cmpi eq, %28, %90 : vector<8x256xi32>
    %92 = vector.shape_cast %89 : vector<1x256xf32> to vector<1x256xf32>
    %93 = vector.broadcast %92 : vector<1x256xf32> to vector<8x256xf32>
    %94 = arith.select %91, %93, %80 : vector<8x256xi1>, vector<8x256xf32>
    %c4 = arith.constant 4 : index
    %95 = memref.load %arg0[%c4] : memref<5xf32, #tpu.memory_space<smem>>
    %96 = vector.broadcast %95 : f32 to vector<8x256xf32>
    %97 = arith.mulf %85, %96 : vector<8x256xf32>
    %98 = arith.addf %84, %97 : vector<8x256xf32>
    %99 = vector.extract_strided_slice %98 {offsets = [0, 0], sizes = [8, 128], strides = [1, 1]} : vector<8x256xf32> to vector<8x128xf32>
    %100 = vector.extract_strided_slice %98 {offsets = [0, 128], sizes = [8, 128], strides = [1, 1]} : vector<8x256xf32> to vector<8x128xf32>
    %101 = arith.maximumf %99, %100 : vector<8x128xf32>
    %c64_i32 = arith.constant 64 : i32
    %102 = tpu.dynamic_rotate %101 by %c64_i32 dim 1 : vector<8x128xf32>, i32 -> vector<8x128xf32>
    %103 = arith.maximumf %101, %102 : vector<8x128xf32>
    %c32_i32 = arith.constant 32 : i32
    %104 = tpu.dynamic_rotate %103 by %c32_i32 dim 1 : vector<8x128xf32>, i32 -> vector<8x128xf32>
    %105 = arith.maximumf %103, %104 : vector<8x128xf32>
    %c16_i32 = arith.constant 16 : i32
    %106 = tpu.dynamic_rotate %105 by %c16_i32 dim 1 : vector<8x128xf32>, i32 -> vector<8x128xf32>
    %107 = arith.maximumf %105, %106 : vector<8x128xf32>
    %108 = tpu.concatenate %107, %107 in 1 : vector<8x128xf32>, vector<8x128xf32> -> vector<8x256xf32>
    %109 = vector.extract_strided_slice %98 {offsets = [0, 0], sizes = [8, 128], strides = [1, 1]} : vector<8x256xf32> to vector<8x128xf32>
    %110 = vector.extract_strided_slice %98 {offsets = [0, 128], sizes = [8, 128], strides = [1, 1]} : vector<8x256xf32> to vector<8x128xf32>
    %111 = arith.minimumf %109, %110 : vector<8x128xf32>
    %c64_i32_16 = arith.constant 64 : i32
    %112 = tpu.dynamic_rotate %111 by %c64_i32_16 dim 1 : vector<8x128xf32>, i32 -> vector<8x128xf32>
    %113 = arith.minimumf %111, %112 : vector<8x128xf32>
    %c32_i32_17 = arith.constant 32 : i32
    %114 = tpu.dynamic_rotate %113 by %c32_i32_17 dim 1 : vector<8x128xf32>, i32 -> vector<8x128xf32>
    %115 = arith.minimumf %113, %114 : vector<8x128xf32>
    %c16_i32_18 = arith.constant 16 : i32
    %116 = tpu.dynamic_rotate %115 by %c16_i32_18 dim 1 : vector<8x128xf32>, i32 -> vector<8x128xf32>
    %117 = arith.minimumf %115, %116 : vector<8x128xf32>
    %118 = tpu.concatenate %117, %117 in 1 : vector<8x128xf32>, vector<8x128xf32> -> vector<8x256xf32>
    %119 = arith.subf %98, %108 : vector<8x256xf32>
    %120 = arith.subf %108, %118 : vector<8x256xf32>
    %121 = tpu.reciprocal %120 : vector<8x256xf32> -> vector<8x256xf32>
    %122 = arith.mulf %119, %121 : vector<8x256xf32>
    %123 = math.exp %122 : vector<8x256xf32>
    %124 = vector.extract_strided_slice %123 {offsets = [0, 0], sizes = [8, 128], strides = [1, 1]} : vector<8x256xf32> to vector<8x128xf32>
    %125 = vector.extract_strided_slice %123 {offsets = [0, 128], sizes = [8, 128], strides = [1, 1]} : vector<8x256xf32> to vector<8x128xf32>
    %126 = arith.addf %124, %125 : vector<8x128xf32>
    %c64_i32_19 = arith.constant 64 : i32
    %127 = tpu.dynamic_rotate %126 by %c64_i32_19 dim 1 : vector<8x128xf32>, i32 -> vector<8x128xf32>
    %128 = arith.addf %126, %127 : vector<8x128xf32>
    %c32_i32_20 = arith.constant 32 : i32
    %129 = tpu.dynamic_rotate %128 by %c32_i32_20 dim 1 : vector<8x128xf32>, i32 -> vector<8x128xf32>
    %130 = arith.addf %128, %129 : vector<8x128xf32>
    %c16_i32_21 = arith.constant 16 : i32
    %131 = tpu.dynamic_rotate %130 by %c16_i32_21 dim 1 : vector<8x128xf32>, i32 -> vector<8x128xf32>
    %132 = arith.addf %130, %131 : vector<8x128xf32>
    %133 = tpu.concatenate %132, %132 in 1 : vector<8x128xf32>, vector<8x128xf32> -> vector<8x256xf32>
    %134 = tpu.reciprocal %133 : vector<8x256xf32> -> vector<8x256xf32>
    %135 = arith.mulf %123, %134 : vector<8x256xf32>
    %c4_i32_22 = arith.constant 4 : i32
    %136 = tpu.dynamic_rotate %135 by %c4_i32_22 dim 0 : vector<8x256xf32>, i32 -> vector<8x256xf32>
    %137 = arith.addf %135, %136 : vector<8x256xf32>
    %cst_23 = arith.constant 5.000000e-01 : f32
    %138 = vector.broadcast %cst_23 : f32 to vector<8x256xf32>
    %139 = arith.mulf %137, %138 : vector<8x256xf32>
    %140 = tpu.concatenate %135, %139, %94 in 0 : vector<8x256xf32>, vector<8x256xf32>, vector<8x256xf32> -> vector<24x256xf32>
    %c0_24 = arith.constant 0 : index
    %c0_25 = arith.constant 0 : index
    %141 = vector.load %arg2[%c0_24, %c0_25] : memref<24x256xf32, #tpu.memory_space<vmem>>, vector<24x256xf32>
    tpu.vector_store %arg2[%c0_24, %c0_25], %140 {strides = array<i32>} : memref<24x256xf32, #tpu.memory_space<vmem>>, vector<24x256xf32>,
    return
  }
}

</mosaic_0001>

<bundles_post_ra>
// kernel: fcgraph_forward.1
= control target key start
LH: loop header
LB: loop body
LE: loop exit
PB: predicated region body
PF: predicated region fallthrough
CT: control target
= control target key end

     0   :  { %7 = vsyncpa [#allocation3], 0  ;;  %s699_s0 = inlined_call_operand.vmem [shape: f32[5], index: 0, kind: input, shape index: {}]   ;;  %s700_s1 = inlined_call_operand.vmem [shape: f32[40,16], index: 1, kind: input, shape index: {}]   ;;  %s701_s2 = inlined_call_operand.vmem [shape: f32[24,256], index: 2, kind: output, shape index: {}]  }
   0x1   :  { %s14_s11 = sshll.u32 %s699_s0, 4  ;;  %s15_s11 = int_to_ptr.vmem [resolvable:$true] %s14_s11 }
   0x2   :  { %s562_s12 = scalar_lea.vmem %s15_s11, 16  ;;  %p567_p1 = scmp.lt.s32.totalorder %s15_s11, %s15_s11 }
   0x3   :  { %p563_p0 = scmp.ne.s32.totalorder %s15_s11, %s562_s12  ;;  %p568_p2 = scmp.lt.s32.totalorder %s562_s12, %s562_s12 }
   0x5   :  { %p569_p3 = por %p568_p2, %p567_p1 }
   0x7   :  { %p570_p4 = pnand %p569_p3, %p563_p0 }
   0x9   :  { %573 = shalt.err (!%p570_p4)
}
   0xa   :  { %s576_s13 = smov [#allocation2]  }
   0xb   :  { %17 = dma.vmem_to_smem %s15_s11, 16, %s576_s13, [#allocation3]  }
   0xc   :  { %574 = dma.done.wait [#allocation3], 16  }
   0xd   :  { %575 = vsyncadd [#allocation3], 4294967280 }
   0xe   :  { %23 = sfence }
   0xf   :  { %v25_v0 = vlaneseq  ;;  %v65_v1 = vld [vmem:[%s700_s1] sm:$0xff]  ;;  %v66_v2 = vld [vmem:[%s700_s1 + $0x8] sm:$0xff]  ;;  %v577_v3 = vmov 0   ;;  %v67_v7 = vld [vmem:[%s700_s1 + $0x10] sm:$0xff]  ;;  %v578_v20 = vmov 0.0   ;;  %vm99_vm8 = vcmask 130048  }
  0x10   :  { %141 = vmatprep.mubr.bf16.mxu1 %v577_v3  ;;  %211 = vmatprep.mubr.bf16.mxu0 %v577_v3  ;;  %v70_v4 = vpack.c.bf16 %v66_v2, %v65_v1  ;;  %v68_v8 = vld [vmem:[%s700_s1 + $0x18] sm:$0xff]  ;;  %v69_v38 = vld [vmem:[%s700_s1 + $0x20] sm:$0xff]  ;;  %s347_s1 = sld [smem:[#allocation2]]  ;;  %s520_s23 = sld [smem:[#allocation2 + $0x1]] }
  0x11   :  { %v26_v5 = vand.u32 127, %v25_v0  ;;  %v608_v6 = vshrl.u32 %v25_v0, 7  ;;  %v617_v17 = vpack.c.bf16 %v68_v8, %v67_v7  ;;  %v72_v39 = vpack.c.bf16 %v69_v38, %v69_v38  ;;  %s645_s24 = sld [smem:[#allocation2 + $0x2]]  ;;  %s647_s25 = sld [smem:[#allocation2 + $0x3]] }
  0x12   :  { %v73_v9 = vunpack.c.l.bf16 %v70_v4  ;;  %v74_v10 = vunpack.c.h.bf16 %v70_v4  ;;  %s649_s26 = sld [smem:[#allocation2 + $0x4]]  ;;  %s579_s27 = smov 64  }
  0x13   :  { %v27_v11 = vadd.s32 128, %v26_v5  ;;  %v30_v12 = vadd.s32 8, %v608_v6  ;;  %v31_v13 = vshra.s32 %v26_v5, 4  ;;  %v45_v14 = vand.u32 15, %v26_v5  ;;  %s580_s4 = smov 32   ;;  %s581_s5 = smov 16  }
  0x14   :  { %v78_v15 = vsub.f32 %v65_v1, %v73_v9  ;;  %v79_v16 = vsub.f32 %v66_v2, %v74_v10  ;;  %v75_v36 = vunpack.c.l.bf16 %v617_v17  ;;  %v76_v37 = vunpack.c.h.bf16 %v617_v17 }
  0x15   :  { %v32_v18 = vshra.s32 %v27_v11, 4  ;;  %v46_v19 = vand.u32 15, %v27_v11  ;;  %vm33_vm0 = vcmp.eq.s32.totalorder %v608_v6, %v31_v13  ;;  %vm35_vm1 = vcmp.eq.s32.totalorder %v30_v12, %v31_v13 }
  0x16   :  { %v503_v21 = vsel %vm33_vm0, 1.0, %v578_v20  ;;  %v505_v22 = vsel %vm35_vm1, 1.0, %v578_v20  ;;  %vm47_vm2 = vcmp.eq.s32.totalorder %v608_v6, %v45_v14  ;;  %vm49_vm3 = vcmp.eq.s32.totalorder %v30_v12, %v45_v14 }
  0x17   :  { %vm34_vm4 = vcmp.eq.s32.totalorder %v608_v6, %v32_v18  ;;  %vm36_vm5 = vcmp.eq.s32.totalorder %v30_v12, %v32_v18  ;;  %vm48_vm6 = vcmp.eq.s32.totalorder %v608_v6, %v46_v19  ;;  %vm50_vm7 = vcmp.eq.s32.totalorder %v30_v12, %v46_v19 }
  0x18   :  { %v504_v23 = vsel %vm34_vm4, 1.0, %v578_v20  ;;  %v506_v24 = vsel %vm36_vm5, 1.0, %v578_v20  ;;  %v508_v25 = vsel %vm48_vm6, 1.0, %v578_v20  ;;  %v510_v26 = vsel %vm50_vm7, 1.0, %v578_v20 }
  0x19   :  { %v60_v27 = vsub.f32 %v504_v23, %v508_v25  ;;  %v62_v28 = vsub.f32 %v506_v24, %v510_v26  ;;  %v507_v29 = vsel %vm47_vm2, 1.0, %v578_v20  ;;  %v509_v30 = vsel %vm49_vm3, 1.0, %v578_v20 }
  0x1a   :  { %v59_v31 = vsub.f32 %v503_v21, %v507_v29  ;;  %v61_v32 = vsub.f32 %v505_v22, %v509_v30  ;;  %v83_v35 = vpack.c.bf16 %v79_v16, %v78_v15  ;;  %v80_v42 = vsub.f32 %v67_v7, %v75_v36 }
  0x1b   :  { %v64_v33 = vpack.c.bf16 %v62_v28, %v60_v27  ;;  %v81_v43 = vsub.f32 %v68_v8, %v76_v37  ;;  %v77_v47 = vunpack.c.l.bf16 %v72_v39  ;;  %v369_v10 = vstv %s520_s23 }
  0x1c   :  { %v63_v34 = vpack.c.bf16 %v61_v32, %v59_v31  ;;  %v86_v40 = vunpack.c.l.bf16 %v83_v35  ;;  %v87_v41 = vunpack.c.h.bf16 %v83_v35  ;;  %vm344_vm9 = vcmp.eq.s32.totalorder %v608_v6, 0 }
  0x1d   :  { %109 = vmatprep.subr.bf16.mxu1 %v64_v33  ;;  %179 = vmatprep.subr.bf16.mxu0 %v64_v33  ;;  %v84_v46 = vpack.c.bf16 %v81_v43, %v80_v42  ;;  %v82_v49 = vsub.f32 %v69_v38, %v77_v47  ;;  %vm365_vm10 = vcmp.eq.s32.totalorder %v608_v6, 1  ;;  %vm388_vm11 = vcmp.eq.s32.totalorder %v608_v6, 2 }
  0x1e   :  { %110 = vmatpush1.bf16.msra.mxu1 %v63_v34  ;;  %180 = vmatpush1.bf16.msra.mxu0 %v63_v34  ;;  %v91_v44 = vsub.f32 %v78_v15, %v86_v40  ;;  %v92_v45 = vsub.f32 %v79_v16, %v87_v41  ;;  %vm411_vm12 = vcmp.eq.s32.totalorder %v608_v6, 3  ;;  %vm434_vm13 = vcmp.eq.s32.totalorder %v608_v6, 4 }
  0x1f   :  { %524 = vmatprep.subr.bf16.mxu1 %v64_v33  ;;  %249 = vmatprep.subr.bf16.mxu0 %v64_v33  ;;  %v88_v50 = vunpack.c.l.bf16 %v84_v46  ;;  %v89_v51 = vunpack.c.h.bf16 %v84_v46  ;;  %v85_v52 = vpack.c.bf16 %v82_v49, %v82_v49 }
  0x20   :  { %v96_v48 = vpack.c.bf16 %v92_v45, %v91_v44  ;;  %v415_v44 = vstv %s647_s25 }
  0x21   :  { %511 = vmatmul.mubr.msk.bf16.vlgmr.msra.gmra.mrb[0].mxu1 %vm99_vm8, %v83_v35  ;;  %514 = vmatmul.mubr.msk.bf16.vlgmr.msra.gmra.mrb[0].mxu0 %vm99_vm8, %v70_v4  ;;  %v93_v53 = vsub.f32 %v80_v42, %v88_v50  ;;  %v94_v54 = vsub.f32 %v81_v43, %v89_v51  ;;  %v90_v55 = vunpack.c.l.bf16 %v85_v52  ;;  %v392_v35 = vstv %s645_s24 }
  0x22   :  { %525 = vmatpush1.bf16.msra.mxu1 %v63_v34  ;;  %250 = vmatpush1.bf16.msra.mxu0 %v63_v34 }
  0x23   :  { %151 = vmatprep.mubr.bf16.mxu1 %v577_v3  ;;  %281 = vmatprep.mubr.bf16.mxu0 %v577_v3  ;;  %v97_v56 = vpack.c.bf16 %v94_v54, %v93_v53  ;;  %v95_v57 = vsub.f32 %v82_v49, %v90_v55  ;;  %v438_v49 = vstv %s649_s26 }
  0x25   :  { %v98_v58 = vpack.c.bf16 %v95_v57, %v95_v57 }
  0x29   :  { %512 = vmatmul.mubr.msk.bf16.gmra.mrb[4].mxu1 %vm99_vm8, %v84_v46 }
  0x2a   :  { %161 = vmatprep.mubr.bf16.mxu1 %v577_v3 }
  0x2d   :  { %517 = vmatmul.mubr.msk.bf16.vlgmr.msra.gmra.mrb[0].mxu0 %vm99_vm8, %v96_v48 }
  0x2e   :  { %291 = vmatprep.mubr.bf16.mxu0 %v577_v3 }
  0x31   :  { %513 = vmatmul.mubr.msk.bf16.gmra.mrb[8].mxu1 %vm99_vm8, %v85_v52 }
  0x32   :  { %221 = vmatprep.mubr.bf16.mxu1 %v577_v3 }
  0x35   :  { %518 = vmatmul.mubr.msk.bf16.gmra.mrb[4].mxu0 %vm99_vm8, %v97_v56 }
  0x36   :  { %301 = vmatprep.mubr.bf16.mxu0 %v577_v3 }
  0x39   :  { %515 = vmatmul.mubr.msk.bf16.vlgmr.msra.gmra.mrb[4].mxu1 %vm99_vm8, %v617_v17 }
  0x3a   :  { %231 = vmatprep.mubr.bf16.mxu1 %v577_v3  ;;  %v348_v3 = vstv %s347_s1 }
  0x3d   :  { %519 = vmatmul.mubr.msk.bf16.gmra.mrb[8].mxu0 %vm99_vm8, %v98_v58 }
  0x41   :  { %516 = vmatmul.mubr.msk.bf16.gmra.mrb[8].mxu1 %vm99_vm8, %v72_v39 }
  0xf4   :  { %v143_v59 = vpop.f32.mrb[0].mxu1 }
  0xf5   :  { %v145_v60 = vpop.f32.mrb[1].mxu1 }
  0xf6   :  { %v147_v61 = vpop.f32.mrb[2].mxu1 }
  0xf7   :  { %v149_v62 = vpop.f32.mrb[3].mxu1 }
 0x100   :  { %v283_v63 = vpop.f32.mrb[0].mxu0 }
 0x101   :  { %v526_v0 = vadd.f32 %v283_v63, %v143_v59  ;;  %v285_v1 = vpop.f32.mrb[1].mxu0 }
 0x102   :  { %v527_v2 = vadd.f32 %v285_v1, %v145_v60  ;;  %v287_v4 = vpop.f32.mrb[2].mxu0 }
 0x103   :  { %v320_v5 = vand.u32 2147483647, %v526_v0  ;;  %v528_v7 = vadd.f32 %v287_v4, %v147_v61  ;;  %v289_v8 = vpop.f32.mrb[3].mxu0 }
 0x104   :  { %v321_v9 = vand.u32 2147483647, %v527_v2  ;;  %v529_v11 = vadd.f32 %v289_v8, %v149_v62 }
 0x105   :  { %v330_v12 = vrot.slane %v320_v5, 4  ;;  %v322_v13 = vand.u32 2147483647, %v528_v7  ;;  %v349_v17 = vmul.f32 %v348_v3, %v320_v5 }
 0x106   :  { %v336_v14 = vrot.slane %v321_v9, 4  ;;  %v323_v15 = vand.u32 2147483647, %v529_v11  ;;  %v350_v21 = vmul.f32 %v348_v3, %v321_v9 }
 0x107   :  { %v331_v16 = vadd.f32 %v330_v12, %v320_v5  ;;  %v351_v18 = vrot.slane %v322_v13, 4  ;;  %v370_v19 = vmul.f32 %v369_v10, %v322_v13 }
 0x108   :  { %v337_v20 = vadd.f32 %v336_v14, %v321_v9  ;;  %v357_v22 = vrot.slane %v323_v15, 4  ;;  %v371_v23 = vmul.f32 %v369_v10, %v323_v15  ;;  %v293_v24 = vpop.f32.mrb[4].mxu0 }
 0x109   :  { %v332_v25 = vrot.slane %v331_v16, 2  ;;  %v352_v26 = vadd.f32 %v351_v18, %v322_v13  ;;  %v372_v27 = vadd.f32 %v370_v19, %v349_v17  ;;  %v295_v28 = vpop.f32.mrb[5].mxu0 }
 0x10a   :  { %v338_v29 = vrot.slane %v337_v20, 2  ;;  %v358_v30 = vadd.f32 %v357_v22, %v323_v15  ;;  %v373_v31 = vadd.f32 %v371_v23, %v350_v21  ;;  %v297_v32 = vpop.f32.mrb[6].mxu0 }
 0x10b   :  { %v333_v33 = vadd.f32 %v332_v25, %v331_v16  ;;  %v353_v34 = vrot.slane %v352_v26, 2  ;;  %v299_v36 = vpop.f32.mrb[7].mxu0 }
 0x10c   :  { %v339_v37 = vadd.f32 %v338_v29, %v337_v20  ;;  %v359_v38 = vrot.slane %v358_v30, 2  ;;  %v223_v39 = vpop.f32.mrb[4].mxu1 }
 0x10d   :  { %v334_v40 = vrot.slane %v333_v33, 1  ;;  %v354_v41 = vadd.f32 %v353_v34, %v352_v26  ;;  %v530_v42 = vadd.f32 %v293_v24, %v223_v39  ;;  %v225_v43 = vpop.f32.mrb[5].mxu1 }
 0x10e   :  { %v340_v45 = vrot.slane %v339_v37, 1  ;;  %v360_v46 = vadd.f32 %v359_v38, %v358_v30  ;;  %v531_v47 = vadd.f32 %v295_v28, %v225_v43  ;;  %v227_v48 = vpop.f32.mrb[6].mxu1 }
 0x10f   :  { %v335_v50 = vadd.f32 %v334_v40, %v333_v33  ;;  %v355_v51 = vrot.slane %v354_v41, 1  ;;  %v324_v52 = vand.u32 2147483647, %v530_v42  ;;  %v532_v53 = vadd.f32 %v297_v32, %v227_v48  ;;  %v229_v54 = vpop.f32.mrb[7].mxu1 }
 0x110   :  { %v341_v55 = vadd.f32 %v340_v45, %v339_v37  ;;  %v361_v56 = vrot.slane %v360_v46, 1  ;;  %v325_v57 = vand.u32 2147483647, %v531_v47  ;;  %v533_v58 = vadd.f32 %v299_v36, %v229_v54  ;;  %v303_v59 = vpop.f32.mrb[8].mxu0 }
 0x111   :  { %v342_v60 = vmul.f32 0.125, %v335_v50  ;;  %v356_v61 = vadd.f32 %v355_v51, %v354_v41  ;;  %v374_v62 = vrot.slane %v324_v52, 4  ;;  %v393_v63 = vmul.f32 %v392_v35, %v324_v52  ;;  %v305_v0 = vpop.f32.mrb[9].mxu0 }
 0x112   :  { %v343_v1 = vmul.f32 0.125, %v341_v55  ;;  %v362_v2 = vadd.f32 %v361_v56, %v360_v46  ;;  %v380_v4 = vrot.slane %v325_v57, 4  ;;  %v394_v5 = vmul.f32 %v392_v35, %v325_v57  ;;  %v307_v7 = vpop.f32.mrb[10].mxu0 }
 0x113   :  { %v345_v8 = vsel %vm344_vm9, %v342_v60, 0.0  ;;  %v363_v3 = vmul.f32 0.125, %v356_v61  ;;  %v375_v9 = vadd.f32 %v374_v62, %v324_v52  ;;  %v395_v10 = vadd.f32 %v393_v63, %v372_v27  ;;  %v308_v11 = vpop.f32.mrb[11].mxu0 }
 0x114   :  { %v346_v12 = vsel %vm344_vm9, %v343_v1, 0.0  ;;  %v364_v13 = vmul.f32 0.125, %v362_v2  ;;  %v381_v14 = vadd.f32 %v380_v4, %v325_v57  ;;  %v396_v15 = vadd.f32 %v394_v5, %v373_v31  ;;  %v233_v16 = vpop.f32.mrb[8].mxu1 }
 0x115   :  { %v366_v17 = vsel %vm365_vm10, %v363_v3, %v345_v8  ;;  %v376_v18 = vrot.slane %v375_v9, 2  ;;  %v326_v19 = vand.u32 2147483647, %v532_v53  ;;  %v327_v20 = vand.u32 2147483647, %v533_v58  ;;  %v235_v21 = vpop.f32.mrb[9].mxu1 }
 0x116   :  { %v367_v22 = vsel %vm365_vm10, %v364_v13, %v346_v12  ;;  %v382_v23 = vrot.slane %v381_v14, 2  ;;  %v534_v24 = vadd.f32 %v303_v59, %v233_v16  ;;  %v535_v25 = vadd.f32 %v305_v0, %v235_v21  ;;  %v237_v26 = vpop.f32.mrb[10].mxu1 }
 0x117   :  { %v377_v27 = vadd.f32 %v376_v18, %v375_v9  ;;  %v397_v28 = vrot.slane %v326_v19, 4  ;;  %v416_v29 = vmul.f32 %v415_v44, %v326_v19  ;;  %v403_v30 = vrot.slane %v327_v20, 4  ;;  %v238_v31 = vpop.f32.mrb[11].mxu1 }
 0x118   :  { %v383_v32 = vadd.f32 %v382_v23, %v381_v14  ;;  %v417_v33 = vmul.f32 %v415_v44, %v327_v20  ;;  %v328_v34 = vand.u32 2147483647, %v534_v24  ;;  %v329_v35 = vand.u32 2147483647, %v535_v25 }
 0x119   :  { %v378_v36 = vrot.slane %v377_v27, 1  ;;  %v398_v37 = vadd.f32 %v397_v28, %v326_v19  ;;  %v418_v38 = vadd.f32 %v416_v29, %v395_v10  ;;  %v404_v39 = vadd.f32 %v403_v30, %v327_v20 }
 0x11a   :  { %v384_v40 = vrot.slane %v383_v32, 1  ;;  %v419_v41 = vadd.f32 %v417_v33, %v396_v15  ;;  %v420_v42 = vrot.slane %v328_v34, 4  ;;  %v439_v43 = vmul.f32 %v438_v49, %v328_v34 }
 0x11b   :  { %v379_v45 = vadd.f32 %v378_v36, %v377_v27  ;;  %v399_v46 = vrot.slane %v398_v37, 2  ;;  %v405_v47 = vrot.slane %v404_v39, 2  ;;  %v426_v48 = vrot.slane %v329_v35, 4 }
 0x11c   :  { %v385_v50 = vadd.f32 %v384_v40, %v383_v32  ;;  %v421_v51 = vadd.f32 %v420_v42, %v328_v34  ;;  %v440_v44 = vmul.f32 %v438_v49, %v329_v35  ;;  %v441_v52 = vadd.f32 %v439_v43, %v418_v38 }
 0x11d   :  { %v386_v53 = vmul.f32 0.125, %v379_v45  ;;  %v400_v54 = vadd.f32 %v399_v46, %v398_v37  ;;  %v406_v55 = vadd.f32 %v405_v47, %v404_v39  ;;  %v427_v56 = vadd.f32 %v426_v48, %v329_v35 }
 0x11e   :  { %v387_v57 = vmul.f32 0.125, %v385_v50  ;;  %v422_v58 = vrot.slane %v421_v51, 2  ;;  %v442_v59 = vadd.f32 %v440_v44, %v419_v41 }
 0x11f   :  { %v389_v60 = vsel %vm388_vm11, %v386_v53, %v366_v17  ;;  %v401_v61 = vrot.slane %v400_v54, 1  ;;  %v407_v62 = vrot.slane %v406_v55, 1  ;;  %v428_v63 = vrot.slane %v427_v56, 2 }
 0x120   :  { %v390_v0 = vsel %vm388_vm11, %v387_v57, %v367_v22  ;;  %v423_v1 = vadd.f32 %v422_v58, %v421_v51  ;;  %v443_v2 = vmax.f32 %v441_v52, %v442_v59  ;;  %v453_v11 = vmin.f32 %v441_v52, %v442_v59 }
 0x121   :  { %v402_v49 = vadd.f32 %v401_v61, %v400_v54  ;;  %v408_v4 = vadd.f32 %v407_v62, %v406_v55  ;;  %v429_v5 = vadd.f32 %v428_v63, %v427_v56 }
 0x122   :  { %v424_v7 = vrot.slane %v423_v1, 1  ;;  %444 = vrot.lane.b32.xlu0 %v443_v2, %s579_s27 }
 0x123   :  { %v409_v8 = vmul.f32 0.125, %v402_v49  ;;  %v410_v3 = vmul.f32 0.125, %v408_v4  ;;  %v430_v9 = vrot.slane %v429_v5, 1 }
 0x124   :  { %v425_v10 = vadd.f32 %v424_v7, %v423_v1 }
 0x125   :  { %v412_v12 = vsel %vm411_vm12, %v409_v8, %v389_v60  ;;  %v413_v13 = vsel %vm411_vm12, %v410_v3, %v390_v0  ;;  %v431_v14 = vadd.f32 %v430_v9, %v429_v5 }
 0x126   :  { %v432_v15 = vmul.f32 0.125, %v425_v10  ;;  %454 = vrot.lane.b32.xlu0 %v453_v11, %s579_s27 }
 0x127   :  { %v433_v16 = vmul.f32 0.125, %v431_v14 }
 0x128   :  { %v435_v17 = vsel %vm434_vm13, %v432_v15, %v412_v12 }
 0x129   :  { %496 = vst [vmem:[%s701_s2 + $0x20] sm:$0xff] %v435_v17  ;;  %v436_v18 = vsel %vm434_vm13, %v433_v16, %v413_v13 }
 0x12a   :  { %497 = vst [vmem:[%s701_s2 + $0x28] sm:$0xff] %v436_v18 }
 0x194   :  { %v445_v19 = vpop.permute.xlu0 %444 }
 0x195   :  { %v446_v20 = vmax.f32 %v443_v2, %v445_v19 }
 0x197   :  { %447 = vrot.lane.b32.xlu1 %v446_v20, %s580_s4 }
 0x198   :  { %v455_v6 = vpop.permute.xlu0 %454 }
 0x199   :  { %v456_v21 = vmin.f32 %v453_v11, %v455_v6 }
 0x19b   :  { %457 = vrot.lane.b32.xlu1 %v456_v21, %s580_s4 }
 0x209   :  { %v448_v22 = vpop.permute.xlu1 %447 }
 0x20a   :  { %v449_v23 = vmax.f32 %v446_v20, %v448_v22 }
 0x20c   :  { %450 = vrot.lane.b32.xlu0 %v449_v23, %s581_s5 }
 0x20d   :  { %v458_v24 = vpop.permute.xlu1 %457 }
 0x20e   :  { %v459_v25 = vmin.f32 %v456_v21, %v458_v24 }
 0x210   :  { %460 = vrot.lane.b32.xlu1 %v459_v25, %s581_s5 }
 0x27e   :  { %v451_v26 = vpop.permute.xlu0 %450 }
 0x27f   :  { %v452_v28 = vmax.f32 %v449_v23, %v451_v26 }
 0x281   :  { %v463_v31 = vsub.f32 %v441_v52, %v452_v28  ;;  %v464_v32 = vsub.f32 %v442_v59, %v452_v28 }
 0x282   :  { %v461_v27 = vpop.permute.xlu1 %460 }
 0x283   :  { %v462_v29 = vmin.f32 %v459_v25, %v461_v27 }
 0x285   :  { %v465_v30 = vsub.f32 %v452_v28, %v462_v29 }
 0x287   :  { %554 = vrcp.f32 %v465_v30 }
 0x291   :  { %v555_v33 = vpop.eup %554 }
 0x292   :  { %v467_v34 = vmul.f32 %v555_v33, %v463_v31  ;;  %v468_v35 = vmul.f32 %v555_v33, %v464_v32 }
 0x294   :  { %v469_v36 = vmul.f32 1.442695, %v467_v34  ;;  %v471_v37 = vmul.f32 1.442695, %v468_v35 }
 0x296   :  { %556 = vpow2.f32 %v469_v36 }
 0x297   :  { %558 = vpow2.f32 %v471_v37 }
 0x2a0   :  { %v557_v38 = vpop.eup %556 }
 0x2a1   :  { %v559_v39 = vpop.eup %558 }
 0x2a2   :  { %v473_v40 = vadd.f32 %v559_v39, %v557_v38 }
 0x2a4   :  { %474 = vrot.lane.b32.xlu0 %v473_v40, %s579_s27 }
 0x316   :  { %v475_v41 = vpop.permute.xlu0 %474 }
 0x317   :  { %v476_v42 = vadd.f32 %v475_v41, %v473_v40 }
 0x319   :  { %477 = vrot.lane.b32.xlu1 %v476_v42, %s580_s4 }
 0x38b   :  { %v478_v43 = vpop.permute.xlu1 %477 }
 0x38c   :  { %v479_v45 = vadd.f32 %v478_v43, %v476_v42 }
 0x38e   :  { %480 = vrot.lane.b32.xlu0 %v479_v45, %s581_s5 }
 0x400   :  { %v481_v46 = vpop.permute.xlu0 %480 }
 0x401   :  { %v482_v47 = vadd.f32 %v481_v46, %v479_v45 }
 0x403   :  { %560 = vrcp.f32 %v482_v47 }
 0x40d   :  { %v561_v48 = vpop.eup %560 }
 0x40e   :  { %v484_v50 = vmul.f32 %v561_v48, %v557_v38  ;;  %v485_v51 = vmul.f32 %v561_v48, %v559_v39 }
 0x410   :  { %v486_v44 = vrot.slane %v484_v50, 4  ;;  %v487_v52 = vrot.slane %v485_v51, 4  ;;  %492 = vst [vmem:[%s701_s2] sm:$0xff] %v484_v50  ;;  %493 = vst [vmem:[%s701_s2 + $0x8] sm:$0xff] %v485_v51 }
 0x412   :  { %v488_v53 = vadd.f32 %v486_v44, %v484_v50  ;;  %v489_v54 = vadd.f32 %v487_v52, %v485_v51 }
 0x414   :  { %v490_v55 = vmul.f32 0.5, %v488_v53  ;;  %v491_v56 = vmul.f32 0.5, %v489_v54 }
 0x416   :  { %494 = vst [vmem:[%s701_s2 + $0x10] sm:$0xff] %v490_v55  ;;  %495 = vst [vmem:[%s701_s2 + $0x18] sm:$0xff] %v491_v56 }
 0x417   :  { %502 = vsyncpa [#allocation3], 1 }

</bundles_post_ra>
